<compile_context>
chip_gen: v7x
topology: tpu7x:2x2x1
jax: 0.10.0
libtpu: 0.0.40
codegen_flags: <defaults>
</compile_context>

<pallas_src>
import functools

import jax
import jax.numpy as jnp
from jax.experimental import pallas as pl
from jax.experimental.pallas import tpu as pltpu

# murmur3 finalizer constants expressed as signed int32.
_MUR1 = 0x85EBCA6B - (1 << 32)
_MUR2 = 0xC2B2AE35 - (1 << 32)
_SEED_MIX = 0x27D4EB2F


def _round_up(v, m):
    return ((v + m - 1) // m) * m


def _dropout_bits(seed, n_rows, n_cols):
    """One (n_rows, n_cols) int32 draw from a counter-based hash.

    Uses only vanilla int32 VPU ops (iota / xor / and / shift / mul), so it
    lowers on Mosaic AND in TPU-interpret mode (pltpu.prng_* does not).
    Logical right shifts are emulated with arithmetic shift + mask.
    Counter layout assumes padded batch < 2**18 columns.
    """
    r = jax.lax.broadcasted_iota(jnp.int32, (n_rows, n_cols), 0)
    c = jax.lax.broadcasted_iota(jnp.int32, (n_rows, n_cols), 1)
    x = c + pl.program_id(0) * jnp.int32(n_cols) + r * jnp.int32(1 << 18)
    x = x + seed * jnp.int32(_SEED_MIX)
    x = x ^ ((x >> 16) & jnp.int32(0xFFFF))
    x = x * jnp.int32(_MUR1)
    x = x ^ ((x >> 13) & jnp.int32(0x7FFFF))
    x = x * jnp.int32(_MUR2)
    x = x ^ ((x >> 16) & jnp.int32(0xFFFF))
    return x


def _n_regressor_kernel(seed_ref, xt_ref, w1_ref, w4_ref, w2_ref, p_ref, out_ref,
                        *, keep_prob, n_h, n_h2, tile_n, matmul_dtype):
    x = xt_ref[...]                                          # (IN_P, TILE_N)

    use_dropout = keep_prob < 1.0                            # static
    if use_dropout:
        # Single draw; three disjoint 10-bit fields -> three masks.
        bits = _dropout_bits(seed_ref[0], n_h, tile_n)
        thr = jnp.int32(min(1024, int(round(keep_prob * 1024.0))))

    # fc1 (BatchNorm folded into w1/b1 by the wrapper) + ReLU + dropout.
    h = jnp.dot(w1_ref[...], x, preferred_element_type=jnp.float32)
    h = jnp.maximum(h + p_ref[0:n_h, 0:1], 0.0)
    if use_dropout:
        h = jnp.where((bits & jnp.int32(0x3FF)) < thr, h, 0.0)

    # fc4 + ReLU + dropout (1/keep_prob already folded into w4).
    h = jnp.dot(w4_ref[...], h.astype(matmul_dtype),
                preferred_element_type=jnp.float32)
    h = jnp.maximum(h + p_ref[0:n_h, 1:2], 0.0)
    if use_dropout:
        h = jnp.where(((bits >> 10) & jnp.int32(0x3FF)) < thr, h, 0.0)

    # fc2 + ReLU + dropout (1/keep_prob already folded into w2).
    h = jnp.dot(w2_ref[...], h.astype(matmul_dtype),
                preferred_element_type=jnp.float32)
    h = jnp.maximum(h + p_ref[0:n_h2, 2:3], 0.0)
    if use_dropout:
        h = jnp.where(((bits[0:n_h2, :] >> 20) & jnp.int32(0x3FF)) < thr, h, 0.0)

    # fc3 (output_size == 1): VPU multiply + sublane reduce -> lane-dense (1, N).
    out = jnp.sum(h * p_ref[0:n_h2, 3:4], axis=0, keepdims=True) + p_ref[0:1, 4:5]
    out_ref[...] = out.astype(out_ref.dtype)


def _choose_tile_n(n, tile_n):
    # Keep >= 2 grid steps when the batch allows it (v7x has 2 TensorCores and
    # the batch axis is marked "parallel"); never shrink below one lane tile.
    half = _round_up(max(1, (n + 1) // 2), 128)
    return max(128, min(tile_n, half))


def n_regressor_forward(x, params, *, p_drop=0.2, seed=0, tile_n=512,
                        matmul_dtype=jnp.bfloat16):
    """Training-mode forward of N_regressor.

    x      : (N, input_size) float32
    params : PyTorch-layout tensors
             (gamma (IN,), beta (IN,), w1 (H,IN), b1 (H,), w4 (H,H), b4 (H,),
              w2 (H2,H), b2 (H2,), w3 (OUT,H2), b3 (OUT,))
    Returns: (N, output_size) float32
    """
    gamma, beta, w1, b1, w4, b4, w2, b2, w3, b3 = params
    n, n_in = x.shape
    n_h = w1.shape[0]
    n_h2 = w2.shape[0]
    n_out = w3.shape[0]
    assert n_out == 1, "fc3 VPU-reduce path assumes output_size == 1"

    x = x.astype(jnp.float32)

    # BatchNorm1d training-mode stats over the full batch (one pass over x),
    # folded directly into fc1 (algebraically exact).
    eps = 1e-5
    mean = jnp.mean(x, axis=0)
    var = jnp.maximum(jnp.mean(x * x, axis=0) - mean * mean, 0.0)
    bn_scale = gamma * jax.lax.rsqrt(var + eps)
    bn_shift = beta - mean * bn_scale
    w1f = w1 * bn_scale[None, :]
    b1f = b1 + jnp.dot(w1, bn_shift)

    # Fold the 1/keep_prob dropout rescale into the next linear layer (exact).
    keep_prob = float(1.0 - p_drop)
    inv_keep = jnp.float32(1.0 / keep_prob) if keep_prob < 1.0 else jnp.float32(1.0)
    w4f = w4 * inv_keep
    w2f = w2 * inv_keep
    w3f = w3 * inv_keep

    # Layout plumbing: batch on lanes, features on sublanes, zero-padded.
    in_p = _round_up(n_in, 8)
    tile_n = _choose_tile_n(n, tile_n)
    n_pad = _round_up(n, tile_n)
    x_t = jnp.pad(x.T.astype(matmul_dtype), ((0, in_p - n_in), (0, n_pad - n)))
    w1p = jnp.pad(w1f, ((0, 0), (0, in_p - n_in))).astype(matmul_dtype)
    w4c = w4f.astype(matmul_dtype)
    w2c = w2f.astype(matmul_dtype)

    # Pack every tiny parameter into one (prow, 8) f32 array (one DMA).
    prow = _round_up(max(n_h, n_h2), 8)
    packed = jnp.zeros((prow, 8), jnp.float32)
    packed = packed.at[:n_h, 0].set(b1f)
    packed = packed.at[:n_h, 1].set(b4)
    packed = packed.at[:n_h2, 2].set(b2)
    packed = packed.at[:n_h2, 3].set(w3f[0, :])
    packed = packed.at[0, 4].set(b3[0])

    kernel = functools.partial(
        _n_regressor_kernel, keep_prob=keep_prob, n_h=n_h, n_h2=n_h2,
        tile_n=tile_n, matmul_dtype=matmul_dtype)

    seed_arr = jnp.asarray([seed], jnp.int32)
    grid = (n_pad // tile_n,)

    out = pl.pallas_call(
        kernel,
        out_shape=jax.ShapeDtypeStruct((n_out, n_pad), jnp.float32),
        grid_spec=pltpu.PrefetchScalarGridSpec(
            num_scalar_prefetch=1,
            grid=grid,
            in_specs=[
                pl.BlockSpec((in_p, tile_n), lambda i, s: (0, i)),  # x^T batch tile
                pl.BlockSpec(w1p.shape, lambda i, s: (0, 0)),       # weights stay
                pl.BlockSpec(w4c.shape, lambda i, s: (0, 0)),       #   resident
                pl.BlockSpec(w2c.shape, lambda i, s: (0, 0)),
                pl.BlockSpec(packed.shape, lambda i, s: (0, 0)),    # packed params
            ],
            out_specs=pl.BlockSpec((n_out, tile_n), lambda i, s: (0, i)),
        ),
        compiler_params=pltpu.CompilerParams(
            dimension_semantics=("parallel",)),   # batch tiles are independent
    )(seed_arr, x_t, w1p, w4c, w2c, packed)

    return out[:, :n].T                                      # back to (N, OUT)


def _reference_forward(x, params):
    """Pure-JAX reference of the same forward pass with dropout disabled."""
    gamma, beta, w1, b1, w4, b4, w2, b2, w3, b3 = params
    eps = 1e-5
    mean = jnp.mean(x, axis=0)
    var = jnp.mean(jnp.square(x - mean), axis=0)
    h = (x - mean) / jnp.sqrt(var + eps) * gamma + beta
    hp = jax.lax.Precision.HIGHEST
    h = jnp.maximum(jnp.dot(h, w1.T, precision=hp) + b1, 0.0)
    h = jnp.maximum(jnp.dot(h, w4.T, precision=hp) + b4, 0.0)
    h = jnp.maximum(jnp.dot(h, w2.T, precision=hp) + b2, 0.0)
    return jnp.dot(h, w3.T, precision=hp) + b3


def _linear_init(key, fan_in, fan_out):
    # PyTorch nn.Linear default init, native (out, in) layout.
    kw, kb = jax.random.split(key)
    bound = 1.0 / float(fan_in) ** 0.5
    w = jax.random.uniform(kw, (fan_out, fan_in), jnp.float32, -bound, bound)
    b = jax.random.uniform(kb, (fan_out,), jnp.float32, -bound, bound)
    return w, b


if __name__ == "__main__":
    # N_regressor(input_size=4, hidden_size=64, output_size=1, dropout=0.2).
    N, IN, H, OUT = 8, 4, 64, 1
    H2 = H // 2
    p_drop = 0.2

    key = jax.random.PRNGKey(0)
    kx, kxb, k1, k4, k2, k3 = jax.random.split(key, 6)

    x = jax.random.normal(kx, (N, IN), jnp.float32)

    gamma = jnp.ones((IN,), jnp.float32)     # BatchNorm1d default affine init
    beta = jnp.zeros((IN,), jnp.float32)

    w1, b1 = _linear_init(k1, IN, H)     # fc1
    w4, b4 = _linear_init(k4, H, H)      # fc4
    w2, b2 = _linear_init(k2, H, H2)     # fc2
    w3, b3 = _linear_init(k3, H2, OUT)   # fc3
    params = (gamma, beta, w1, b1, w4, b4, w2, b2, w3, b3)

    # 1) Deterministic check: p=0 -> dropout is identity; f32 matmul operands so
    #    the kernel must match the pure-JAX reference tightly.
    y_eval = jax.block_until_ready(
        n_regressor_forward(x, params, p_drop=0.0, matmul_dtype=jnp.float32))
    y_ref = _reference_forward(x, params)
    assert y_eval.shape == (N, OUT)
    assert jnp.allclose(y_eval, y_ref, rtol=1e-3, atol=1e-3), (y_eval, y_ref)

    # 2) Multi-tile path (grid > 1, padded batch) against the reference.
    x_big = jax.random.normal(kxb, (300, IN), jnp.float32)
    y_big = jax.block_until_ready(
        n_regressor_forward(x_big, params, p_drop=0.0, matmul_dtype=jnp.float32))
    y_big_ref = _reference_forward(x_big, params)
    assert y_big.shape == (300, OUT)
    assert jnp.allclose(y_big, y_big_ref, rtol=1e-3, atol=1e-3)

    # 3) Training-mode forward: in-kernel hash-based dropout, bf16 MXU operands.
    y_drop = jax.block_until_ready(
        n_regressor_forward(x, params, p_drop=p_drop, seed=123))
    assert y_drop.shape == (N, OUT)
    assert bool(jnp.all(jnp.isfinite(y_drop)))
    assert not bool(jnp.allclose(y_drop, y_eval)), "dropout path had no effect"

    print("KERNEL_OK")
</pallas_src>

<mosaic_0001>
module attributes {stable_mosaic.version = 11 : i64} {
  func.func @_n_regressor_kernel(%arg0: i32, %arg1: memref<1xi32, #tpu.memory_space<smem>>, %arg2: memref<8x128xf32, #tpu.memory_space<vmem>>, %arg3: memref<64x8xf32, #tpu.memory_space<vmem>>, %arg4: memref<64x64xf32, #tpu.memory_space<vmem>>, %arg5: memref<32x64xf32, #tpu.memory_space<vmem>>, %arg6: memref<64x8xf32, #tpu.memory_space<vmem>>, %arg7: memref<1x128xf32, #tpu.memory_space<vmem>>) attributes {dimension_semantics = [#tpu.dimension_semantics<parallel>], iteration_bounds = array<i64: 1>, scalar_prefetch = 1 : i64, scratch_operands = 0 : i64, tpu.core_type = #tpu.core_type<tc>, window_params = [{transform_indices = @transform_0, window_bounds = array<i64: 8, 128>}, {pipeline_mode = #tpu.pipeline_mode<synchronous>, transform_indices = @transform_1, window_bounds = array<i64: 64, 8>}, {pipeline_mode = #tpu.pipeline_mode<synchronous>, transform_indices = @transform_2, window_bounds = array<i64: 64, 64>}, {pipeline_mode = #tpu.pipeline_mode<synchronous>, transform_indices = @transform_3, window_bounds = array<i64: 32, 64>}, {pipeline_mode = #tpu.pipeline_mode<synchronous>, transform_indices = @transform_4, window_bounds = array<i64: 64, 8>}, {transform_indices = @transform_5, window_bounds = array<i64: 1, 128>}]} {
    %c0 = arith.constant 0 : index
    %c0_0 = arith.constant 0 : index
    %0 = vector.load %arg2[%c0, %c0_0] : memref<8x128xf32, #tpu.memory_space<vmem>>, vector<8x128xf32>
    %c0_1 = arith.constant 0 : index
    %c0_2 = arith.constant 0 : index
    %1 = vector.load %arg3[%c0_1, %c0_2] : memref<64x8xf32, #tpu.memory_space<vmem>>, vector<64x8xf32>
    %cst = arith.constant dense<0.000000e+00> : vector<64x128xf32>
    %2 = tpu.matmul %1, %0, %cst {dimension_numbers = #tpu.dot_dimension_numbers<[1], [0], [0], [1], [0, 0, 1, 1], [], []>} : vector<64x8xf32>, vector<8x128xf32>, vector<64x128xf32> -> vector<64x128xf32>
    %c0_3 = arith.constant 0 : index
    %c0_4 = arith.constant 0 : index
    %3 = vector.load %arg6[%c0_3, %c0_4] : memref<64x8xf32, #tpu.memory_space<vmem>>, vector<64x1xf32>
    %4 = vector.broadcast %3 : vector<64x1xf32> to vector<64x128xf32>
    %5 = arith.addf %2, %4 : vector<64x128xf32>
    %cst_5 = arith.constant 0.000000e+00 : f32
    %6 = vector.broadcast %cst_5 : f32 to vector<64x128xf32>
    %7 = arith.maximumf %5, %6 : vector<64x128xf32>
    %c0_6 = arith.constant 0 : index
    %c0_7 = arith.constant 0 : index
    %8 = vector.load %arg4[%c0_6, %c0_7] : memref<64x64xf32, #tpu.memory_space<vmem>>, vector<64x64xf32>
    %cst_8 = arith.constant dense<0.000000e+00> : vector<64x128xf32>
    %9 = tpu.matmul %8, %7, %cst_8 {dimension_numbers = #tpu.dot_dimension_numbers<[1], [0], [0], [1], [0, 0, 1, 1], [], []>} : vector<64x64xf32>, vector<64x128xf32>, vector<64x128xf32> -> vector<64x128xf32>
    %c0_9 = arith.constant 0 : index
    %c1 = arith.constant 1 : index
    %10 = vector.load %arg6[%c0_9, %c1] : memref<64x8xf32, #tpu.memory_space<vmem>>, vector<64x1xf32>
    %11 = vector.broadcast %10 : vector<64x1xf32> to vector<64x128xf32>
    %12 = arith.addf %9, %11 : vector<64x128xf32>
    %cst_10 = arith.constant 0.000000e+00 : f32
    %13 = vector.broadcast %cst_10 : f32 to vector<64x128xf32>
    %14 = arith.maximumf %12, %13 : vector<64x128xf32>
    %c0_11 = arith.constant 0 : index
    %c0_12 = arith.constant 0 : index
    %15 = vector.load %arg5[%c0_11, %c0_12] : memref<32x64xf32, #tpu.memory_space<vmem>>, vector<32x64xf32>
    %cst_13 = arith.constant dense<0.000000e+00> : vector<32x128xf32>
    %16 = tpu.matmul %15, %14, %cst_13 {dimension_numbers = #tpu.dot_dimension_numbers<[1], [0], [0], [1], [0, 0, 1, 1], [], []>} : vector<32x64xf32>, vector<64x128xf32>, vector<32x128xf32> -> vector<32x128xf32>
    %c0_14 = arith.constant 0 : index
    %c2 = arith.constant 2 : index
    %17 = vector.load %arg6[%c0_14, %c2] : memref<64x8xf32, #tpu.memory_space<vmem>>, vector<32x1xf32>
    %18 = vector.broadcast %17 : vector<32x1xf32> to vector<32x128xf32>
    %19 = arith.addf %16, %18 : vector<32x128xf32>
    %cst_15 = arith.constant 0.000000e+00 : f32
    %20 = vector.broadcast %cst_15 : f32 to vector<32x128xf32>
    %21 = arith.maximumf %19, %20 : vector<32x128xf32>
    %c0_16 = arith.constant 0 : index
    %c3 = arith.constant 3 : index
    %22 = vector.load %arg6[%c0_16, %c3] : memref<64x8xf32, #tpu.memory_space<vmem>>, vector<32x1xf32>
    %23 = vector.broadcast %22 : vector<32x1xf32> to vector<32x128xf32>
    %24 = arith.mulf %21, %23 : vector<32x128xf32>
    %cst_17 = arith.constant dense<0.000000e+00> : vector<128xf32>
    %25 = vector.multi_reduction <add>, %24, %cst_17 [0] : vector<32x128xf32> to vector<128xf32>
    %26 = vector.shape_cast %25 : vector<128xf32> to vector<1x128xf32>
    %c0_18 = arith.constant 0 : index
    %c4 = arith.constant 4 : index
    %27 = vector.load %arg6[%c0_18, %c4] : memref<64x8xf32, #tpu.memory_space<vmem>>, vector<1x1xf32>
    %28 = vector.broadcast %27 : vector<1x1xf32> to vector<1x128xf32>
    %29 = arith.addf %26, %28 : vector<1x128xf32>
    %c0_19 = arith.constant 0 : index
    %c0_20 = arith.constant 0 : index
    %30 = vector.load %arg7[%c0_19, %c0_20] : memref<1x128xf32, #tpu.memory_space<vmem>>, vector<1x128xf32>
    tpu.vector_store %arg7[%c0_19, %c0_20], %29 {strides = array<i32>} : memref<1x128xf32, #tpu.memory_space<vmem>>, vector<1x128xf32>,
    return
  }
  func.func @transform_0(%arg0: i32, %arg1: memref<1xi32, #tpu.memory_space<smem>>) -> (i32, i32) {
    %c0_i32 = arith.constant 0 : i32
    %c0_i32_0 = arith.constant 0 : i32
    return %c0_i32, %arg0 : i32, i32
  }
  func.func @transform_1(%arg0: i32, %arg1: memref<1xi32, #tpu.memory_space<smem>>) -> (i32, i32) {
    %c0_i32 = arith.constant 0 : i32
    %c0_i32_0 = arith.constant 0 : i32
    %c0_i32_1 = arith.constant 0 : i32
    return %c0_i32, %c0_i32_0 : i32, i32
  }
  func.func @transform_2(%arg0: i32, %arg1: memref<1xi32, #tpu.memory_space<smem>>) -> (i32, i32) {
    %c0_i32 = arith.constant 0 : i32
    %c0_i32_0 = arith.constant 0 : i32
    %c0_i32_1 = arith.constant 0 : i32
    return %c0_i32, %c0_i32_0 : i32, i32
  }
  func.func @transform_3(%arg0: i32, %arg1: memref<1xi32, #tpu.memory_space<smem>>) -> (i32, i32) {
    %c0_i32 = arith.constant 0 : i32
    %c0_i32_0 = arith.constant 0 : i32
    %c0_i32_1 = arith.constant 0 : i32
    return %c0_i32, %c0_i32_0 : i32, i32
  }
  func.func @transform_4(%arg0: i32, %arg1: memref<1xi32, #tpu.memory_space<smem>>) -> (i32, i32) {
    %c0_i32 = arith.constant 0 : i32
    %c0_i32_0 = arith.constant 0 : i32
    %c0_i32_1 = arith.constant 0 : i32
    return %c0_i32, %c0_i32_0 : i32, i32
  }
  func.func @transform_5(%arg0: i32, %arg1: memref<1xi32, #tpu.memory_space<smem>>) -> (i32, i32) {
    %c0_i32 = arith.constant 0 : i32
    %c0_i32_0 = arith.constant 0 : i32
    return %c0_i32, %arg0 : i32, i32
  }
}

</mosaic_0001>

<bundles_post_ra>
// kernel: tpu_custom_call.1
= control target key start
LH: loop header
LB: loop body
LE: loop exit
PB: predicated region body
PF: predicated region fallthrough
CT: control target
= control target key end

     0   :  { %vm80_vm0 = vcmask 64512   ;;  %v769_v4 = vmov 0   ;;  %s956_s0 = inlined_call_operand.<no memory space> [shape: s32[1], index: 0, kind: input, shape index: {}]   ;;  %s957_s1 = inlined_call_operand.vmem [shape: f32[8,128], index: 1, kind: input, shape index: {}]   ;;  %s958_s2 = inlined_call_operand.vmem [shape: f32[64,8], index: 2, kind: input, shape index: {}]   ;;  %s959_s3 = inlined_call_operand.vmem [shape: f32[64,64], index: 3, kind: input, shape index: {}]   ;;  %s960_s4 = inlined_call_operand.vmem [shape: f32[32,64], index: 4, kind: input, shape index: {}]   ;;  %s961_s5 = inlined_call_operand.vmem [shape: f32[64,8], index: 5, kind: input, shape index: {}]   ;;  %s962_s6 = inlined_call_operand.hbm [shape: f32[1,128], index: 6, kind: output, shape index: {}]  }
   0x1   :  { %v23_v0 = vld [vmem:[%s957_s1] sm:$0xff]  ;;  %v25_v2 = vld [vmem:[%s958_s2 + $0x8] sm:$0xff]  ;;  %v26_v3 = vld [vmem:[%s958_s2 + $0x10] sm:$0xff]  ;;  %735 = vset.pattern.permute.xlu0 %v769_v4  ;;  %736 = vset.pattern.permute.xlu1 %v769_v4 }
   0x2   :  { %v24_v1 = vld [vmem:[%s958_s2] sm:$0xff]  ;;  %633 = vmatprep.subr.mxu0 %v23_v0  ;;  %v832_v6 = vld [vmem:[%s961_s5 + $0x10] sm:$0xff]  ;;  %v27_v7 = vld [vmem:[%s958_s2 + $0x18] sm:$0xff] }
   0x3   :  { %635 = vmatprep.mubr.msk.f32.mxu0 %vm80_vm0, %v24_v1  ;;  %634 = vmatpush3.msra.mxu0 %v23_v0  ;;  %v827_v5 = vld [vmem:[%s961_s5] sm:$0xff]  ;;  %v846_v9 = vld [vmem:[%s961_s5 + $0x8] sm:$0xff] }
   0x4   :  { %636 = vmatmul.mubr.msk.f32.vlgmr.msra.gmra.mrb[0].mxu0 %vm80_vm0, %v25_v2  ;;  %42 = vperm.xlu0 %735, %v827_v5   ;;  %v28_v8 = vld [vmem:[%s958_s2 + $0x20] sm:$0xff] }
   0x5   :  { %638 = vmatprep.mubr.msk.f32.mxu0 %vm80_vm0, %v26_v3  ;;  %52 = vperm.xlu1 %736, %v832_v6  }
   0x6   :  { %12 = vsyncpa [#allocation5], 0  ;;  %v851_v10 = vld [vmem:[%s961_s5 + $0x18] sm:$0xff]  ;;  %v29_v11 = vld [vmem:[%s958_s2 + $0x28] sm:$0xff]  ;;  %vm258_vm1 = vcmask 523264   ;;  %v770_v19 = vmov 1  }
   0x7   :  { %v30_v12 = vld [vmem:[%s958_s2 + $0x30] sm:$0xff]  ;;  %v36_v13 = vld [vmem:[%s961_s5 + $0x20] sm:$0xff]  ;;  %v37_v14 = vld [vmem:[%s961_s5 + $0x28] sm:$0xff]  ;;  %v771_v0 = vmov 2   ;;  %v772_v1 = vmov 3   ;;  %v773_v2 = vmov 4  }
   0x8   :  { %639 = vmatmul.mubr.msk.f32.gmra.mrb[2].mxu0 %vm80_vm0, %v27_v7  ;;  %47 = vperm.xlu0 %735, %v846_v9   ;;  %v31_v15 = vld [vmem:[%s958_s2 + $0x38] sm:$0xff]  ;;  %v38_v16 = vld [vmem:[%s961_s5 + $0x30] sm:$0xff]  ;;  %v218_v18 = vld [vmem:[%s959_s3] sm:$0xff] }
   0x9   :  { %641 = vmatprep.mubr.msk.f32.mxu0 %vm80_vm0, %v28_v8  ;;  %57 = vperm.xlu1 %736, %v851_v10   ;;  %v39_v17 = vld [vmem:[%s961_s5 + $0x38] sm:$0xff]  ;;  %v219_v56 = vld [vmem:[%s959_s3 + $0x8] sm:$0xff]  ;;  %v220_v57 = vld [vmem:[%s959_s3 + $0x10] sm:$0xff] }
   0xa   :  { %663 = vmatprep.mubr.msk.f32.mxu1 %vm258_vm1, %v218_v18  ;;  %v221_v58 = vld [vmem:[%s959_s3 + $0x18] sm:$0xff]  ;;  %v222_v59 = vld [vmem:[%s959_s3 + $0x20] sm:$0xff]  ;;  %v223_v60 = vld [vmem:[%s959_s3 + $0x28] sm:$0xff] }
   0xb   :  { %v224_v61 = vld [vmem:[%s959_s3 + $0x30] sm:$0xff]  ;;  %v225_v62 = vld [vmem:[%s959_s3 + $0x38] sm:$0xff]  ;;  %v396_v63 = vld [vmem:[%s960_s4] sm:$0xff] }
   0xc   :  { %642 = vmatmul.mubr.msk.f32.gmra.mrb[4].mxu0 %vm80_vm0, %v29_v11  ;;  %62 = vperm.xlu0 %735, %v36_v13   ;;  %v554_v3 = vld [vmem:[%s961_s5] sm:$0x1] }
   0xd   :  { %644 = vmatprep.mubr.msk.f32.mxu0 %vm80_vm0, %v30_v12  ;;  %67 = vperm.xlu1 %736, %v37_v14  }
  0x10   :  { %645 = vmatmul.mubr.msk.f32.gmra.mrb[6].mxu0 %vm80_vm0, %v31_v15  ;;  %72 = vperm.xlu0 %735, %v38_v16  }
  0x11   :  { %77 = vperm.xlu1 %736, %v39_v17   ;;  %691 = vmatprep.mubr.msk.f32.mxu0 %vm258_vm1, %v396_v63 }
  0x14   :  { %737 = vset.pattern.permute.xlu0 %v770_v19 }
  0x15   :  { %738 = vset.pattern.permute.xlu1 %v770_v19  ;;  %227 = vperm.xlu0 %737, %v827_v5  }
  0x16   :  { %231 = vperm.xlu1 %738, %v846_v9  }
  0x19   :  { %239 = vperm.xlu0 %737, %v851_v10  }
  0x1a   :  { %235 = vperm.xlu1 %738, %v832_v6  }
  0x1d   :  { %247 = vperm.xlu0 %737, %v37_v14  }
  0x1e   :  { %243 = vperm.xlu1 %738, %v36_v13  }
  0x21   :  { %255 = vperm.xlu0 %737, %v39_v17  }
  0x22   :  { %251 = vperm.xlu1 %738, %v38_v16  }
  0x25   :  { %740 = vset.pattern.permute.xlu0 %v771_v0 }
  0x26   :  { %739 = vset.pattern.permute.xlu1 %v771_v0  ;;  %411 = vperm.xlu0 %740, %v846_v9  }
  0x27   :  { %406 = vperm.xlu1 %739, %v827_v5  }
  0x2a   :  { %741 = vset.pattern.permute.xlu0 %v772_v1 }
  0x2b   :  { %416 = vperm.xlu1 %739, %v832_v6   ;;  %526 = vperm.xlu0 %741, %v827_v5  }
  0x2f   :  { %421 = vperm.xlu1 %739, %v851_v10   ;;  %538 = vperm.xlu0 %741, %v851_v10  }
  0x33   :  { %742 = vset.pattern.permute.xlu1 %v772_v1  ;;  %744 = vset.pattern.permute.xlu0 %v773_v2 }
  0x34   :  { %530 = vperm.xlu1 %742, %v846_v9  }
  0x38   :  { %534 = vperm.xlu1 %742, %v832_v6  }
  0x3c   :  { %743 = vset.pattern.permute.xlu1 %v773_v2 }
  0x3d   :  { %557 = vperm.xlu1 %743, %v554_v3  }
  0x83   :  { %v43_v20 = vpop.permute.xlu0 %42 }
  0x84   :  { %v53_v21 = vpop.permute.xlu1 %52 }
  0x87   :  { %v48_v22 = vpop.permute.xlu0 %47 }
  0x88   :  { %v58_v23 = vpop.permute.xlu1 %57 }
  0x8b   :  { %v63_v36 = vpop.permute.xlu0 %62 }
  0x8c   :  { %v68_v33 = vpop.permute.xlu1 %67 }
  0x8f   :  { %v73_v48 = vpop.permute.xlu0 %72 }
  0x90   :  { %v78_v45 = vpop.permute.xlu1 %77 }
  0x94   :  { %v228_v4 = vpop.permute.xlu0 %227 }
  0x95   :  { %v232_v7 = vpop.permute.xlu1 %231 }
  0x98   :  { %v240_v5 = vpop.permute.xlu0 %239 }
  0x99   :  { %v236_v11 = vpop.permute.xlu1 %235 }
  0x9c   :  { %v248_v6 = vpop.permute.xlu0 %247 }
  0xd7   :  { %v637_v24 = vpop.f32.mrb[0].mxu0 }
  0xd8   :  { %v177_v25 = vadd.f32 %v637_v24, %v48_v22  ;;  %v171_v26 = vpop.f32.mrb[1].mxu0 }
  0xd9   :  { %v172_v27 = vadd.f32 %v171_v26, %v43_v20  ;;  %v244_v20 = vpop.permute.xlu1 %243 }
  0xda   :  { %v211_v28 = vmax.f32 %v177_v25, 0.0 }
  0xdb   :  { %v210_v29 = vmax.f32 %v172_v27, 0.0  ;;  %v640_v30 = vpop.f32.mrb[2].mxu0 }
  0xdc   :  { %v187_v31 = vadd.f32 %v640_v30, %v58_v23  ;;  %v181_v32 = vpop.f32.mrb[3].mxu0 }
  0xdd   :  { %v182_v34 = vadd.f32 %v181_v32, %v53_v21  ;;  %v697_v35 = vpack.c.bf16 %v211_v28, %v210_v29  ;;  %v256_v29 = vpop.permute.xlu0 %255  ;;  %v252_v32 = vpop.permute.xlu1 %251 }
  0xde   :  { %v213_v37 = vmax.f32 %v187_v31, 0.0 }
  0xdf   :  { %v212_v38 = vmax.f32 %v182_v34, 0.0  ;;  %v643_v39 = vpop.f32.mrb[4].mxu0  ;;  %698 = vmatprep.subr.bf16.mxu1 %v697_v35 }
  0xe0   :  { %v197_v40 = vadd.f32 %v643_v39, %v68_v33  ;;  %v191_v41 = vpop.f32.mrb[5].mxu0  ;;  %700 = vmatpush3.bf16.msra.mxu1 %v697_v35 }
  0xe1   :  { %v701_v42 = vpack.c.bf16 %v213_v37, %v212_v38  ;;  %v192_v43 = vadd.f32 %v191_v41, %v63_v36  ;;  %v398_v41 = vld [vmem:[%s960_s4 + $0x10] sm:$0xff] }
  0xe2   :  { %v215_v44 = vmax.f32 %v197_v40, 0.0  ;;  %v397_v40 = vld [vmem:[%s960_s4 + $0x8] sm:$0xff] }
  0xe3   :  { %v214_v46 = vmax.f32 %v192_v43, 0.0  ;;  %v646_v47 = vpop.f32.mrb[6].mxu0  ;;  %702 = vmatprep.subr.bf16.mxu1 %v701_v42  ;;  %v407_v43 = vpop.permute.xlu1 %406 }
  0xe4   :  { %v207_v49 = vadd.f32 %v646_v47, %v78_v45  ;;  %v201_v50 = vpop.f32.mrb[7].mxu0  ;;  %704 = vmatpush3.bf16.msra.mxu1 %v701_v42  ;;  %v399_v42 = vld [vmem:[%s960_s4 + $0x18] sm:$0xff]  ;;  %v412_v45 = vpop.permute.xlu0 %411  ;;  %s774_s4 = smov [#allocation4]  }
  0xe5   :  { %v705_v51 = vpack.c.bf16 %v215_v44, %v214_v46  ;;  %v202_v52 = vadd.f32 %v201_v50, %v73_v48  ;;  %s568_s25 = sshll.u32 %s774_s4, 4  ;;  %s569_s25 = int_to_ptr.vmem [resolvable:$true] %s568_s25 }
  0xe6   :  { %v217_v53 = vmax.f32 %v207_v49, 0.0  ;;  %s745_s26 = scalar_lea.vmem %s569_s25, 16  ;;  %s749_s27 = scalar_lea.vmem %s569_s25, 32 }
  0xe7   :  { %v216_v54 = vmax.f32 %v202_v52, 0.0  ;;  %706 = vmatprep.subr.bf16.mxu1 %v705_v51  ;;  %v417_v44 = vpop.permute.xlu1 %416  ;;  %p746_p0 = scmp.ne.s32.totalorder %s569_s25, %s745_s26  ;;  %p750_p1 = scmp.lt.s32.totalorder %s569_s25, %s569_s25 }
  0xe8   :  { %708 = vmatpush3.bf16.msra.mxu1 %v705_v51  ;;  %p751_p2 = scmp.lt.s32.totalorder %s749_s27, %s745_s26 }
  0xe9   :  { %v709_v55 = vpack.c.bf16 %v217_v53, %v216_v54  ;;  %v527_v53 = vpop.permute.xlu0 %526 }
  0xea   :  { %p752_p3 = por %p751_p2, %p750_p1 }
  0xeb   :  { %710 = vmatprep.subr.bf16.mxu1 %v709_v55  ;;  %v422_v46 = vpop.permute.xlu1 %421 }
  0xec   :  { %712 = vmatpush3.bf16.msra.mxu1 %v709_v55  ;;  %p753_p4 = pnand %p752_p3, %p746_p0 }
  0xed   :  { %v539_v1 = vpop.permute.xlu0 %538 }
  0xef   :  { %664 = vmatmul.mubr.msk.f32.vlgmr.msra.gmra.mrb[0].mxu1 %vm258_vm1, %v219_v56  ;;  %v531_v52 = vpop.permute.xlu1 %530 }
  0xf0   :  { %666 = vmatprep.mubr.msk.f32.mxu1 %vm258_vm1, %v220_v57 }
  0xf3   :  { %667 = vmatmul.mubr.msk.f32.gmra.mrb[2].mxu1 %vm258_vm1, %v221_v58  ;;  %v535_v0 = vpop.permute.xlu1 %534 }
  0xf4   :  { %669 = vmatprep.mubr.msk.f32.mxu1 %vm258_vm1, %v222_v59 }
  0xf7   :  { %670 = vmatmul.mubr.msk.f32.gmra.mrb[4].mxu1 %vm258_vm1, %v223_v60 }
  0xf8   :  { %672 = vmatprep.mubr.msk.f32.mxu1 %vm258_vm1, %v224_v61 }
  0xfb   :  { %673 = vmatmul.mubr.msk.f32.gmra.mrb[6].mxu1 %vm258_vm1, %v225_v62 }
 0x1c2   :  { %v665_v8 = vpop.f32.mrb[0].mxu1 }
 0x1c3   :  { %v355_v12 = vadd.f32 %v665_v8, %v232_v7  ;;  %v349_v10 = vpop.f32.mrb[1].mxu1 }
 0x1c4   :  { %v350_v13 = vadd.f32 %v349_v10, %v228_v4 }
 0x1c5   :  { %v389_v14 = vmax.f32 %v355_v12, 0.0 }
 0x1c6   :  { %v388_v9 = vmax.f32 %v350_v13, 0.0  ;;  %v668_v15 = vpop.f32.mrb[2].mxu1  ;;  %v558_v13 = vpop.permute.xlu1 %557 }
 0x1c7   :  { %v365_v16 = vadd.f32 %v668_v15, %v240_v5  ;;  %v359_v17 = vpop.f32.mrb[3].mxu1 }
 0x1c8   :  { %v713_v18 = vpack.c.bf16 %v389_v14, %v388_v9  ;;  %v360_v19 = vadd.f32 %v359_v17, %v236_v11 }
 0x1c9   :  { %v391_v21 = vmax.f32 %v365_v16, 0.0 }
 0x1ca   :  { %v390_v22 = vmax.f32 %v360_v19, 0.0  ;;  %v671_v23 = vpop.f32.mrb[4].mxu1  ;;  %714 = vmatprep.subr.bf16.mxu0 %v713_v18 }
 0x1cb   :  { %v375_v24 = vadd.f32 %v671_v23, %v248_v6  ;;  %v369_v25 = vpop.f32.mrb[5].mxu1  ;;  %716 = vmatpush3.bf16.msra.mxu0 %v713_v18 }
 0x1cc   :  { %v717_v26 = vpack.c.bf16 %v391_v21, %v390_v22  ;;  %v370_v27 = vadd.f32 %v369_v25, %v244_v20 }
 0x1cd   :  { %v393_v28 = vmax.f32 %v375_v24, 0.0 }
 0x1ce   :  { %v392_v30 = vmax.f32 %v370_v27, 0.0  ;;  %v674_v31 = vpop.f32.mrb[6].mxu1  ;;  %718 = vmatprep.subr.bf16.mxu0 %v717_v26 }
 0x1cf   :  { %v385_v33 = vadd.f32 %v674_v31, %v256_v29  ;;  %v379_v34 = vpop.f32.mrb[7].mxu1  ;;  %720 = vmatpush3.bf16.msra.mxu0 %v717_v26 }
 0x1d0   :  { %v721_v35 = vpack.c.bf16 %v393_v28, %v392_v30  ;;  %v380_v36 = vadd.f32 %v379_v34, %v252_v32 }
 0x1d1   :  { %v395_v37 = vmax.f32 %v385_v33, 0.0 }
 0x1d2   :  { %v394_v38 = vmax.f32 %v380_v36, 0.0  ;;  %722 = vmatprep.subr.bf16.mxu0 %v721_v35 }
 0x1d3   :  { %724 = vmatpush3.bf16.msra.mxu0 %v721_v35 }
 0x1d4   :  { %v725_v39 = vpack.c.bf16 %v395_v37, %v394_v38 }
 0x1d6   :  { %726 = vmatprep.subr.bf16.mxu0 %v725_v39 }
 0x1d7   :  { %728 = vmatpush3.bf16.msra.mxu0 %v725_v39 }
 0x1da   :  { %692 = vmatmul.mubr.msk.f32.vlgmr.msra.gmra.mrb[8].mxu0 %vm258_vm1, %v397_v40 }
 0x1db   :  { %694 = vmatprep.mubr.msk.f32.mxu0 %vm258_vm1, %v398_v41 }
 0x1de   :  { %695 = vmatmul.mubr.msk.f32.gmra.mrb[10].mxu0 %vm258_vm1, %v399_v42 }
 0x2ad   :  { %v693_v47 = vpop.f32.mrb[8].mxu0 }
 0x2ae   :  { %v508_v48 = vadd.f32 %v693_v47, %v412_v45  ;;  %v502_v49 = vpop.f32.mrb[9].mxu0 }
 0x2af   :  { %v503_v50 = vadd.f32 %v502_v49, %v407_v43 }
 0x2b0   :  { %v522_v51 = vmax.f32 %v508_v48, 0.0 }
 0x2b1   :  { %v521_v54 = vmax.f32 %v503_v50, 0.0  ;;  %v696_v55 = vpop.f32.mrb[10].mxu0 }
 0x2b2   :  { %v542_v56 = vmul.f32 %v531_v52, %v522_v51  ;;  %v518_v57 = vadd.f32 %v696_v55, %v422_v46  ;;  %v512_v58 = vpop.f32.mrb[11].mxu0 }
 0x2b3   :  { %v541_v59 = vmul.f32 %v527_v53, %v521_v54  ;;  %v513_v60 = vadd.f32 %v512_v58, %v417_v44 }
 0x2b4   :  { %v524_v62 = vmax.f32 %v518_v57, 0.0 }
 0x2b5   :  { %v545_v61 = vadd.f32 %v542_v56, %v541_v59  ;;  %v523_v63 = vmax.f32 %v513_v60, 0.0 }
 0x2b6   :  { %v544_v4 = vmul.f32 %v539_v1, %v524_v62 }
 0x2b7   :  { %v543_v2 = vmul.f32 %v535_v0, %v523_v63 }
 0x2b9   :  { %v546_v3 = vadd.f32 %v545_v61, %v543_v2 }
 0x2bb   :  { %v547_v7 = vadd.f32 %v546_v3, %v544_v4 }
 0x2bd   :  { %v548_v5 = vrot.slane %v547_v7, 4 }
 0x2bf   :  { %v549_v8 = vadd.f32 %v548_v5, %v547_v7 }
 0x2c1   :  { %v550_v11 = vrot.slane %v549_v8, 2 }
 0x2c3   :  { %v551_v12 = vadd.f32 %v550_v11, %v549_v8 }
 0x2c5   :  { %v552_v10 = vrot.slane %v551_v12, 1 }
 0x2c7   :  { %v553_v14 = vadd.f32 %v552_v10, %v551_v12 }
 0x2c9   :  { %v560_v9 = vadd.f32 %v558_v13, %v553_v14 }
 0x2cb   :  { %561 = vst [vmem:[#allocation4] sm:$0x1] %v560_v9 }
 0x2cc   :  { %756 = shalt.err (!%p753_p4)
}
 0x2cd   :  { %s757_s2 = scalar_lea.hbm %s962_s6, 16 }
 0x2ce   :  { %p758_p5 = scmp.ne.s32.totalorder %s962_s6, %s757_s2  ;;  %p761_p6 = scmp.lt.u32.totalorder %s757_s2, %s962_s6 }
 0x2d0   :  { %p763_p7 = pnand %p761_p6, %p758_p5 }
 0x2d2   :  { %766 = shalt.err (!%p763_p7)
}
 0x2d3   :  { %571 = dma.vmem_to_hbm [thread:$0]  %s569_s25, 16, %s962_s6, [#allocation5]  }
 0x2d4   :  { %767 = dma.done.wait [#allocation5], 16  }
 0x2d5   :  { %768 = vsyncadd [#allocation5], 4294967280 }
 0x2d6   :  { %575 = vsyncpa [#allocation5], 1 }

</bundles_post_ra>
